<compile_context>
chip_gen: v5e
topology: v5e:2x2
jax: 0.10.0
libtpu: 0.0.40
codegen_flags: <defaults>
</compile_context>

<pallas_src>
import jax
import jax.numpy as jnp
from jax import lax
from jax.experimental import pallas as pl
from jax.experimental.pallas import tpu as pltpu

BN_EPS = 1e-5
_INV_SQRT2 = 0.7071067811865476


def _epfm_mlp_kernel(x_ref, w1_ref, b1_ref, w2_ref, b2_ref, o_ref):
    """Conv1x1(BN1+concat folded) -> GELU -> Conv1x1(BN2 folded), channel-first."""
    x = x_ref[...]                                       # (Cin, tile_m), lane-dense

    # Conv2d(2*Cin, Cout, 1) with BN1 + identity-concat folded in:
    # (Cout, Cin) @ (Cin, tile_m) -> (Cout, tile_m), f32 accumulation on MXU.
    h = jnp.dot(w1_ref[...], x, preferred_element_type=jnp.float32)
    h = h + b1_ref[...]                                  # (Cout, 1) lane-broadcast

    # nn.GELU() default is the exact (erf) variant; keep it for bit-faithfulness.
    h = 0.5 * h * (1.0 + lax.erf(h * _INV_SQRT2))

    # Conv2d(Cout, Cout, 1) with BN2 folded in.
    y = jnp.dot(w2_ref[...], h, preferred_element_type=jnp.float32)
    y = y + b2_ref[...]

    o_ref[...] = y.astype(o_ref.dtype)                   # lane-dense (Cout, tile_m)


def epfm_mlp_pallas(x3d, folded, *, tile_m):
    """x3d: (N, Cin, HWpad) channel-first.  Returns (N, Cout, HWpad) float32."""
    n, cin, hw = x3d.shape
    w1, b1 = folded["w1_cf"], folded["b1_cf"]
    w2, b2 = folded["w2_cf"], folded["b2_cf"]
    cout = w1.shape[0]
    assert hw % tile_m == 0, "pad the flattened spatial axis to a multiple of tile_m"

    full = lambda b, i: (0, 0)
    row_tile = lambda b, i: (b, 0, i)

    return pl.pallas_call(
        _epfm_mlp_kernel,
        out_shape=jax.ShapeDtypeStruct((n, cout, hw), jnp.float32),
        grid_spec=pltpu.PrefetchScalarGridSpec(
            num_scalar_prefetch=0,
            grid=(n, hw // tile_m),
            in_specs=[
                pl.BlockSpec((None, cin, tile_m), row_tile),  # X tile (Cin, tile_m)
                pl.BlockSpec((cout, cin), full),              # folded conv1 weight
                pl.BlockSpec((cout, 1), full),                # folded conv1 bias
                pl.BlockSpec((cout, cout), full),             # folded conv2 weight
                pl.BlockSpec((cout, 1), full),                # folded conv2 bias
            ],
            out_specs=pl.BlockSpec((None, cout, tile_m), row_tile),
        ),
        compiler_params=pltpu.CompilerParams(
            dimension_semantics=("parallel", "parallel")),
    )(x3d, w1, b1, w2, b2)


def init_epfm_params(key, in_channels, out_channels):
    """Deterministic synthetic parameters matching the PyTorch module shapes."""
    cin2 = in_channels * 2
    ks = jax.random.split(key, 10)

    def bn_fold(kg, kb, km, kv, c):
        gamma = 1.0 + 0.1 * jax.random.normal(kg, (c,), jnp.float32)
        beta = 0.1 * jax.random.normal(kb, (c,), jnp.float32)
        running_mean = 0.05 * jax.random.normal(km, (c,), jnp.float32)
        running_var = 1.0 + 0.1 * jax.random.uniform(kv, (c,), jnp.float32)
        scale = gamma * lax.rsqrt(running_var + BN_EPS)
        shift = beta - running_mean * scale
        return scale.reshape(1, c), shift.reshape(1, c)

    bn1_scale, bn1_shift = bn_fold(ks[0], ks[1], ks[2], ks[3], cin2)
    bn2_scale, bn2_shift = bn_fold(ks[4], ks[5], ks[6], ks[7], out_channels)

    # Conv2d(cin2, cout, 1) weight stored as (cin2, cout) for x @ W convention.
    w1 = (jax.random.normal(ks[8], (cin2, out_channels), jnp.float32)
          * (1.0 / jnp.sqrt(cin2)))
    b1 = 0.02 * jnp.arange(out_channels, dtype=jnp.float32).reshape(1, out_channels)
    w2 = (jax.random.normal(ks[9], (out_channels, out_channels), jnp.float32)
          * (1.0 / jnp.sqrt(out_channels)))
    b2 = -0.01 * jnp.arange(out_channels, dtype=jnp.float32).reshape(1, out_channels)

    return dict(bn1_scale=bn1_scale, bn1_shift=bn1_shift,
                w1=w1, b1=b1, w2=w2, b2=b2,
                bn2_scale=bn2_scale, bn2_shift=bn2_shift)


def fold_epfm_params(params, in_channels):
    """One-time host/XLA work: fold BN1/BN2 and the identity concat into the convs.

    Returns channel-first weights for the kernel:
      w1_cf (Cout, Cin), b1_cf (Cout, 1), w2_cf (Cout, Cout), b2_cf (Cout, 1).
    """
    cin = in_channels
    s1, t1 = params["bn1_scale"], params["bn1_shift"]      # (1, 2*Cin)
    w1, cb1 = params["w1"], params["b1"]                   # (2*Cin, Cout), (1, Cout)
    w2, cb2 = params["w2"], params["b2"]                   # (Cout, Cout), (1, Cout)
    s2, t2 = params["bn2_scale"], params["bn2_shift"]      # (1, Cout)

    # x_cat = [x, x] along channels (identity EEU/HPU), so BN1 + concat fold as:
    w1_eff = s1[0, :cin, None] * w1[:cin] + s1[0, cin:, None] * w1[cin:]  # (Cin, Cout)
    b1_eff = t1 @ w1 + cb1                                                # (1, Cout)
    # BN2 folds into conv2 as a column scale + shift.
    w2_eff = w2 * s2                                                      # (Cout, Cout)
    b2_eff = cb2 * s2 + t2                                                # (1, Cout)

    cout = w1.shape[1]
    return dict(
        w1_cf=jnp.asarray(w1_eff.T, jnp.float32),
        b1_cf=jnp.asarray(b1_eff.T.reshape(cout, 1), jnp.float32),
        w2_cf=jnp.asarray(w2_eff.T, jnp.float32),
        b2_cf=jnp.asarray(b2_eff.T.reshape(cout, 1), jnp.float32),
    )


@jax.jit
def epfm_forward(x_nchw, folded):
    """EPFM.forward.  x_nchw: (N, Cin, H, W) -> (N, Cout, H, W) float32."""
    n, cin, h, w = x_nchw.shape
    cout = folded["w1_cf"].shape[0]
    hw = h * w

    # Lane axis must be a multiple of 128; aim for large tiles (low per-step
    # overhead) while keeping padding small.  All static at trace time.
    tile_m = min(4096, ((hw + 127) // 128) * 128)
    hw_pad = ((hw + tile_m - 1) // tile_m) * tile_m

    x3d = x_nchw.reshape(n, cin, hw)                 # free reshape, no transpose
    if hw_pad != hw:
        x3d = jnp.pad(x3d, ((0, 0), (0, 0), (0, hw_pad - hw)))

    y3d = epfm_mlp_pallas(x3d, folded, tile_m=tile_m)  # (N, Cout, hw_pad)
    y3d = y3d[:, :, :hw] if hw_pad != hw else y3d
    return y3d.reshape(n, cout, h, w)                # free reshape back to NCHW

    # self.sample is None in this configuration (sample=False).


def _reference_forward(x_nchw, params):
    """Pure-JAX reference mirroring the PyTorch module math (un-folded)."""
    n, cin, h, w = x_nchw.shape
    x_cat = jnp.concatenate([x_nchw, x_nchw], axis=1)       # identity EEU / HPU
    x2d = jnp.transpose(x_cat, (0, 2, 3, 1)).reshape(-1, 2 * cin)
    z = x2d * params["bn1_scale"] + params["bn1_shift"]
    z = z @ params["w1"] + params["b1"]
    z = 0.5 * z * (1.0 + lax.erf(z / jnp.sqrt(2.0)))
    z = z @ params["w2"] + params["b2"]
    z = z * params["bn2_scale"] + params["bn2_shift"]
    cout = params["w1"].shape[1]
    return jnp.transpose(z.reshape(n, h, w, cout), (0, 3, 1, 2))


if __name__ == "__main__":
    key = jax.random.PRNGKey(0)
    k_x, k_p = jax.random.split(key)

    in_channels, out_channels = 4, 8
    N, H, W = 2, 16, 16

    x = jax.random.normal(k_x, (N, in_channels, H, W), jnp.float32)
    params = init_epfm_params(k_p, in_channels, out_channels)
    folded = fold_epfm_params(params, in_channels)

    y = epfm_forward(x, folded)
    y = jax.block_until_ready(y)

    y_ref = _reference_forward(x, params)
    assert y.shape == (N, out_channels, H, W)
    assert jnp.allclose(y, y_ref, atol=5e-4, rtol=5e-4), "kernel mismatch vs reference"

    print("KERNEL_OK")
</pallas_src>

<mosaic_0001>
module attributes {stable_mosaic.version = 11 : i64} {
  func.func @_epfm_mlp_kernel(%arg0: i32, %arg1: i32, %arg2: memref<1x4x256xf32, #tpu.memory_space<vmem>>, %arg3: memref<8x4xf32, #tpu.memory_space<vmem>>, %arg4: memref<8x1xf32, #tpu.memory_space<vmem>>, %arg5: memref<8x8xf32, #tpu.memory_space<vmem>>, %arg6: memref<8x1xf32, #tpu.memory_space<vmem>>, %arg7: memref<1x8x256xf32, #tpu.memory_space<vmem>>) attributes {dimension_semantics = [#tpu.dimension_semantics<parallel>, #tpu.dimension_semantics<parallel>], iteration_bounds = array<i64: 2, 1>, scalar_prefetch = 0 : i64, scratch_operands = 0 : i64, tpu.core_type = #tpu.core_type<tc>, window_params = [{transform_indices = @transform_0, window_bounds = array<i64: 1, 4, 256>}, {pipeline_mode = #tpu.pipeline_mode<synchronous>, transform_indices = @transform_1, window_bounds = array<i64: 8, 4>}, {pipeline_mode = #tpu.pipeline_mode<synchronous>, transform_indices = @transform_2, window_bounds = array<i64: 8, 1>}, {pipeline_mode = #tpu.pipeline_mode<synchronous>, transform_indices = @transform_3, window_bounds = array<i64: 8, 8>}, {pipeline_mode = #tpu.pipeline_mode<synchronous>, transform_indices = @transform_4, window_bounds = array<i64: 8, 1>}, {transform_indices = @transform_5, window_bounds = array<i64: 1, 8, 256>}]} {
    %c0 = arith.constant 0 : index
    %c0_0 = arith.constant 0 : index
    %c0_1 = arith.constant 0 : index
    %0 = vector.load %arg2[%c0, %c0_0, %c0_1] : memref<1x4x256xf32, #tpu.memory_space<vmem>>, vector<1x4x256xf32>
    %1 = vector.shape_cast %0 : vector<1x4x256xf32> to vector<4x256xf32>
    %c0_2 = arith.constant 0 : index
    %c0_3 = arith.constant 0 : index
    %2 = vector.load %arg3[%c0_2, %c0_3] : memref<8x4xf32, #tpu.memory_space<vmem>>, vector<8x4xf32>
    %cst = arith.constant dense<0.000000e+00> : vector<8x256xf32>
    %3 = tpu.matmul %2, %1, %cst {dimension_numbers = #tpu.dot_dimension_numbers<[1], [0], [0], [1], [0, 0, 1, 1], [], []>} : vector<8x4xf32>, vector<4x256xf32>, vector<8x256xf32> -> vector<8x256xf32>
    %c0_4 = arith.constant 0 : index
    %c0_5 = arith.constant 0 : index
    %4 = vector.load %arg4[%c0_4, %c0_5] : memref<8x1xf32, #tpu.memory_space<vmem>>, vector<8x1xf32>
    %5 = vector.broadcast %4 : vector<8x1xf32> to vector<8x256xf32>
    %6 = arith.addf %3, %5 : vector<8x256xf32>
    %cst_6 = arith.constant 5.000000e-01 : f32
    %7 = vector.broadcast %cst_6 : f32 to vector<8x256xf32>
    %8 = arith.mulf %7, %6 : vector<8x256xf32>
    %cst_7 = arith.constant 0.707106769 : f32
    %9 = vector.broadcast %cst_7 : f32 to vector<8x256xf32>
    %10 = arith.mulf %6, %9 : vector<8x256xf32>
    %11 = math.erf %10 : vector<8x256xf32>
    %cst_8 = arith.constant 1.000000e+00 : f32
    %12 = vector.broadcast %cst_8 : f32 to vector<8x256xf32>
    %13 = arith.addf %12, %11 : vector<8x256xf32>
    %14 = arith.mulf %8, %13 : vector<8x256xf32>
    %c0_9 = arith.constant 0 : index
    %c0_10 = arith.constant 0 : index
    %15 = vector.load %arg5[%c0_9, %c0_10] : memref<8x8xf32, #tpu.memory_space<vmem>>, vector<8x8xf32>
    %cst_11 = arith.constant dense<0.000000e+00> : vector<8x256xf32>
    %16 = tpu.matmul %15, %14, %cst_11 {dimension_numbers = #tpu.dot_dimension_numbers<[1], [0], [0], [1], [0, 0, 1, 1], [], []>} : vector<8x8xf32>, vector<8x256xf32>, vector<8x256xf32> -> vector<8x256xf32>
    %c0_12 = arith.constant 0 : index
    %c0_13 = arith.constant 0 : index
    %17 = vector.load %arg6[%c0_12, %c0_13] : memref<8x1xf32, #tpu.memory_space<vmem>>, vector<8x1xf32>
    %18 = vector.broadcast %17 : vector<8x1xf32> to vector<8x256xf32>
    %19 = arith.addf %16, %18 : vector<8x256xf32>
    %c0_14 = arith.constant 0 : index
    %c0_15 = arith.constant 0 : index
    %c0_16 = arith.constant 0 : index
    %20 = vector.load %arg7[%c0_14, %c0_15, %c0_16] : memref<1x8x256xf32, #tpu.memory_space<vmem>>, vector<1x8x256xf32>
    %21 = vector.shape_cast %20 : vector<1x8x256xf32> to vector<8x256xf32>
    %22 = vector.shape_cast %19 : vector<8x256xf32> to vector<1x8x256xf32>
    tpu.vector_store %arg7[%c0_14, %c0_15, %c0_16], %22 {strides = array<i32>} : memref<1x8x256xf32, #tpu.memory_space<vmem>>, vector<1x8x256xf32>,
    return
  }
  func.func @transform_0(%arg0: i32, %arg1: i32) -> (i32, i32, i32) {
    %c0_i32 = arith.constant 0 : i32
    %c0_i32_0 = arith.constant 0 : i32
    return %arg0, %c0_i32, %arg1 : i32, i32, i32
  }
  func.func @transform_1(%arg0: i32, %arg1: i32) -> (i32, i32) {
    %c0_i32 = arith.constant 0 : i32
    %c0_i32_0 = arith.constant 0 : i32
    %c0_i32_1 = arith.constant 0 : i32
    return %c0_i32, %c0_i32_0 : i32, i32
  }
  func.func @transform_2(%arg0: i32, %arg1: i32) -> (i32, i32) {
    %c0_i32 = arith.constant 0 : i32
    %c0_i32_0 = arith.constant 0 : i32
    %c0_i32_1 = arith.constant 0 : i32
    return %c0_i32, %c0_i32_0 : i32, i32
  }
  func.func @transform_3(%arg0: i32, %arg1: i32) -> (i32, i32) {
    %c0_i32 = arith.constant 0 : i32
    %c0_i32_0 = arith.constant 0 : i32
    %c0_i32_1 = arith.constant 0 : i32
    return %c0_i32, %c0_i32_0 : i32, i32
  }
  func.func @transform_4(%arg0: i32, %arg1: i32) -> (i32, i32) {
    %c0_i32 = arith.constant 0 : i32
    %c0_i32_0 = arith.constant 0 : i32
    %c0_i32_1 = arith.constant 0 : i32
    return %c0_i32, %c0_i32_0 : i32, i32
  }
  func.func @transform_5(%arg0: i32, %arg1: i32) -> (i32, i32, i32) {
    %c0_i32 = arith.constant 0 : i32
    %c0_i32_0 = arith.constant 0 : i32
    return %arg0, %c0_i32, %arg1 : i32, i32, i32
  }
}

</mosaic_0001>

<bundles_post_ra>
// kernel: epfm_forward.1
= control target key start
LH: loop header
LB: loop body
LE: loop exit
PB: predicated region body
PF: predicated region fallthrough
CT: control target
= control target key end

     0   :  { %s659_s18 = smov 0   ;;  %s661_s19 = smov 0   ;;  %s726_s0 = inlined_call_operand.vmem [shape: f32[2,4,256], index: 0, kind: input, shape index: {}]   ;;  %s727_s1 = inlined_call_operand.vmem [shape: f32[8,4], index: 1, kind: input, shape index: {}]   ;;  %s728_s2 = inlined_call_operand.vmem [shape: f32[8,1], index: 2, kind: input, shape index: {}]   ;;  %s729_s3 = inlined_call_operand.vmem [shape: f32[8,8], index: 3, kind: input, shape index: {}]   ;;  %s730_s4 = inlined_call_operand.vmem [shape: f32[8,1], index: 4, kind: input, shape index: {}]   ;;  %s731_s5 = inlined_call_operand.vmem [shape: f32[2,8,256], index: 5, kind: output, shape index: {}]  }
   0x1   :  { %s663_s20 = smov 0  }
   0x2 LB: > { %s27_s21 = sadd.s32 1, %s622_s19  ;;  %p557_p0 = scmp.ge.s32.totalorder %s626_s20, 1  ;;  %s626_s20 = sphi %s663_s20, %s15_s20   ;;  %s622_s19 = sphi %s661_s19, %s733_s19   ;;  %s618_s18 = sphi %s659_s18, %s732_s18  }
   0x3   : > { %p29_p1 = scmp.ge.s32.totalorder %s27_s21, 2  ;;  %p208_p2 = scmp.lt.s32.totalorder %s626_s20, 3 }
   0x5   : > { %s735_s21 = smov (%p29_p1, %s27_s21), 0  ;;  %p209_p3 = pnand %p557_p0, %p208_p2 }
   0x6   : > { %p245_p4 = scmp.lt.s32.totalorder (!%p209_p3), %s618_s18, 1 }
   0x7   : > { %212 = sbr.rel (%p209_p3) target bundleno = 341 (0x155), region = 40 }
   0xc   : > { %v266_v0 = vld [vmem:[%s728_s2] sm:$0xff]  ;;  %v628_v1 = vmov 0   ;;  %s737_s18 = smov (!%p245_p4, %s618_s18), 1  ;;  %vm280_vm0 = vcmask 1043456   ;;  %vm276_vm1 = vcmask 31744   ;;  %vm420_vm10 = vcmask 64512  }
   0xd   : > { %599 = vset.pattern.permute.xlu0 %v628_v1  ;;  %s572_s24 = sshll.u32 %s737_s18, 3  ;;  %v414_v3 = vld [vmem:[%s730_s4] sm:$0xff]  ;;  %s573_s9 = sshll.u32 %s737_s18, 4 }
   0xe   : > { %269 = vperm.xlu0 %599, %v266_v0   ;;  %s252_s27 = scalar_lea.vmem %s726_s0, %s572_s24  ;;  %v265_v4 = vld [vmem:[%s727_s1] sm:$0xff]  ;;  %s262_s12 = scalar_lea.vmem %s731_s5, %s573_s9 }
   0xf   : > { %v264_v2 = vld [vmem:[%s252_s27] sm:$0xff] }
  0x10   : > { %273 = vst [vmem:[#allocation1] ss:$2 sm:$0xff] %v264_v2 }
  0x16   : > { %417 = vperm.xlu0 %599, %v414_v3  }
  0x17   : > { %v274_v5 = vld.sshfl [vmem:[#allocation1] sm:$0xff pattern:$0x75316420]  ;;  %v275_v6 = vld.sshfl [vmem:[#allocation1 + $0x8] sm:$0xff pattern:$0x75316420] }
  0x18   : > { %562 = vmatpush.msk.msra.mxu0 %vm280_vm0, %v274_v5  ;;  %564 = vmatpush.msk.msra.mxu1 %vm280_vm0, %v275_v6 }
  0x19   : > { %563 = vmatmul.msk.f32.vlgmr.msra.gmra.mxu0 %vm276_vm1, %v265_v4  ;;  %565 = vmatmul.msk.f32.vlgmr.msra.gmra.mxu1 %vm276_vm1, %v265_v4 }
  0x80   : > { %v270_v7 = vpop.permute.xlu0 %269 }
  0x96   : > { %v302_v8 = vpop.f32.mrf.mxu0  ;;  %v322_v9 = vpop.f32.mrf.mxu1 }
  0x97   : > { %v692_v10 = vadd.f32 %v302_v8, %v270_v7  ;;  %v694_v11 = vadd.f32 %v322_v9, %v270_v7 }
  0x99   : > { %v697_v12 = vmul.f32 0.70710677, %v692_v10  ;;  %v700_v13 = vmul.f32 0.70710677, %v694_v11 }
  0x9b   : > { %v329_v14 = vmul.f32 %v697_v12, %v697_v12  ;;  %v369_v15 = vmul.f32 %v700_v13, %v700_v13 }
  0x9d   : > { %v330_v16 = vmin.f32 %v329_v14, 16.0  ;;  %v370_v17 = vmin.f32 %v369_v15, 16.0 }
  0x9f   : > { %v331_v18 = vmul.f32 2.1237322e-06, %v330_v16  ;;  %v371_v19 = vmul.f32 2.1237322e-06, %v370_v17  ;;  %v342_v20 = vmul.f32 3.8918573e-05, %v330_v16 }
  0xa0   : > { %v382_v21 = vmul.f32 3.8918573e-05, %v370_v17 }
  0xa1   : > { %v332_v22 = vadd.f32 0.00028619796, %v331_v18  ;;  %v372_v23 = vadd.f32 0.00028619796, %v371_v19  ;;  %v343_v24 = vadd.f32 0.001143296, %v342_v20 }
  0xa2   : > { %v383_v25 = vadd.f32 0.001143296, %v382_v21 }
  0xa3   : > { %v333_v26 = vmul.f32 %v332_v22, %v330_v16  ;;  %v373_v27 = vmul.f32 %v372_v23, %v370_v17  ;;  %v344_v28 = vmul.f32 %v343_v24, %v330_v16  ;;  %v325_v24 = vmul.f32 0.5, %v692_v10 }
  0xa4   : > { %v384_v29 = vmul.f32 %v383_v25, %v370_v17 }
  0xa5   : > { %v334_v30 = vadd.f32 0.0036580483, %v333_v26  ;;  %v345_v31 = vadd.f32 0.014752088, %v344_v28  ;;  %v374_v33 = vadd.f32 0.0036580483, %v373_v27 }
  0xa6   : > { %v385_v32 = vadd.f32 0.014752088, %v384_v29  ;;  %v418_v29 = vpop.permute.xlu0 %417 }
  0xa7   : > { %v346_v34 = vmul.f32 %v345_v31, %v330_v16  ;;  %v335_v36 = vmul.f32 %v334_v30, %v330_v16  ;;  %v375_v39 = vmul.f32 %v374_v33, %v370_v17 }
  0xa8   : > { %v386_v35 = vmul.f32 %v385_v32, %v370_v17 }
  0xa9   : > { %v347_v37 = vadd.f32 0.112945676, %v346_v34  ;;  %v336_v42 = vadd.f32 0.05243302, %v335_v36  ;;  %v376_v45 = vadd.f32 0.05243302, %v375_v39 }
  0xaa   : > { %v387_v38 = vadd.f32 0.112945676, %v386_v35 }
  0xab   : > { %v348_v40 = vmul.f32 %v347_v37, %v330_v16  ;;  %v337_v48 = vmul.f32 %v336_v42, %v330_v16  ;;  %v377_v51 = vmul.f32 %v376_v45, %v370_v17 }
  0xac   : > { %v388_v41 = vmul.f32 %v387_v38, %v370_v17 }
  0xad   : > { %v349_v43 = vadd.f32 0.4994258, %v348_v40  ;;  %v338_v52 = vadd.f32 0.18741608, %v337_v48  ;;  %v378_v53 = vadd.f32 0.18741608, %v377_v51 }
  0xae   : > { %v389_v44 = vadd.f32 0.4994258, %v388_v41 }
  0xaf   : > { %v350_v46 = vmul.f32 %v349_v43, %v330_v16  ;;  %v339_v55 = vmul.f32 %v338_v52, %v330_v16  ;;  %v379_v58 = vmul.f32 %v378_v53, %v370_v17 }
  0xb0   : > { %v390_v47 = vmul.f32 %v389_v44, %v370_v17 }
  0xb1   : > { %v351_v49 = vadd.f32 1.0, %v350_v46  ;;  %v340_v61 = vadd.f32 1.1283791, %v339_v55  ;;  %v380_v3 = vadd.f32 1.1283791, %v379_v58 }
  0xb2   : > { %v391_v50 = vadd.f32 1.0, %v390_v47 }
  0xb3   : > { %600 = vrcp.f32 %v351_v49  ;;  %v363_v62 = vand.u32 2147483648, %v351_v49  ;;  %v361_v1 = vand.u32 2147483647, %v351_v49  ;;  %vm357_vm4 = vweird.f32 %v351_v49 }
  0xb4   : > { %602 = vrcp.f32 %v391_v50  ;;  %v403_v2 = vand.u32 2147483648, %v391_v50  ;;  %v401_v5 = vand.u32 2147483647, %v391_v50  ;;  %vm397_vm6 = vweird.f32 %v391_v50 }
  0xb5   : > { %v364_v7 = vor.u32 1.1754944e-38, %v363_v62  ;;  %v341_v9 = vmul.f32 %v340_v61, %v697_v12  ;;  %vm362_vm7 = vcmp.eq.f32.partialorder %v361_v1, 8.507059e+37  ;;  %v381_v16 = vmul.f32 %v380_v3, %v700_v13  ;;  %v413_v13 = vld [vmem:[%s729_s3] sm:$0xff] }
  0xb6   : > { %v404_v15 = vor.u32 1.1754944e-38, %v403_v2  ;;  %vm402_vm9 = vcmp.eq.f32.partialorder %v401_v5, 8.507059e+37  ;;  %v326_v12 = vmul.f32 0.5, %v694_v11 }
  0xb9   : > { %v601_v54 = vpop.eup %600 }
  0xba   : > { %v603_v56 = vpop.eup %602  ;;  %v353_v57 = vmul.f32 %v601_v54, %v351_v49  ;;  %vm358_vm2 = vweird.f32 %v601_v54 }
  0xbb   : > { %v393_v59 = vmul.f32 %v603_v56, %v391_v50  ;;  %vm398_vm3 = vweird.f32 %v603_v56  ;;  %vm359_vm5 = vmor %vm357_vm4, %vm358_vm2 }
  0xbc   : > { %v354_v60 = vsub.f32 1.0, %v353_v57  ;;  %vm399_vm8 = vmor %vm397_vm6, %vm398_vm3 }
  0xbd   : > { %v394_v63 = vsub.f32 1.0, %v393_v59 }
  0xbe   : > { %v355_v0 = vmul.f32 %v601_v54, %v354_v60 }
  0xbf   : > { %v395_v4 = vmul.f32 %v603_v56, %v394_v63 }
  0xc0   : > { %v356_v6 = vadd.f32 %v601_v54, %v355_v0 }
  0xc1   : > { %v396_v8 = vadd.f32 %v603_v56, %v395_v4 }
  0xc2   : > { %v360_v14 = vsel %vm359_vm5, %v601_v54, %v356_v6 }
  0xc3   : > { %v365_v17 = vsel %vm362_vm7, %v364_v7, %v360_v14  ;;  %v400_v18 = vsel %vm399_vm8, %v603_v56, %v396_v8 }
  0xc4   : > { %v366_v19 = vmul.f32 %v365_v17, %v341_v9  ;;  %v405_v20 = vsel %vm402_vm9, %v404_v15, %v400_v18 }
  0xc5   : > { %v406_v21 = vmul.f32 %v405_v20, %v381_v16 }
  0xc6   : > { %v566_v22 = vclamps-f32 %v366_v19, 1.0 }
  0xc7   : > { %v567_v23 = vclamps-f32 %v406_v21, 1.0 }
  0xc8   : > { %v409_v25 = vadd.f32 1.0, %v566_v22 }
  0xc9   : > { %v410_v26 = vadd.f32 1.0, %v567_v23 }
  0xca   : > { %v411_v27 = vmul.f32 %v409_v25, %v325_v24 }
  0xcb   : > { %v412_v28 = vmul.f32 %v410_v26, %v326_v12 }
  0xcc   : > { %439 = vmatpush.msra.mxu2 %v411_v27 }
  0xcd   : > { %459 = vmatpush.msra.mxu3 %v412_v28  ;;  %568 = vmatmul.msk.f32.vlgmr.msra.gmra.mxu2 %vm420_vm10, %v413_v13 }
  0xce   : > { %569 = vmatmul.msk.f32.vlgmr.msra.gmra.mxu3 %vm420_vm10, %v413_v13 }
 0x150   : > { %v441_v10 = vpop.f32.mrf.mxu2 }
 0x151   : > { %v442_v11 = vadd.f32 %v441_v10, %v418_v29  ;;  %v461_v30 = vpop.f32.mrf.mxu3 }
 0x152   : > { %v462_v31 = vadd.f32 %v461_v30, %v418_v29 }
 0x153   : > { %464 = vst [vmem:[%s262_s12] sm:$0xff] %v442_v11 }
 0x154   : > { %465 = vst [vmem:[%s262_s12 + $0x8] sm:$0xff] %v462_v31 }
 0x155 PF: > { %s15_s20 = sadd.s32 1, %s626_s20   ;;  %s732_s18 = smov %s622_s19 }
 0x156   : > { %p12_p5 = scmp.ge.s32.totalorder %s15_s20, 4   ;;  %s733_s19 = smov %s735_s21 }
 0x158   :  { %14 = sbr.rel (!%p12_p5) target bundleno = 2 (0x2), region = 70 }

</bundles_post_ra>
